<compile_context>
chip_gen: v7x
topology: tpu7x:2x2x1
jax: 0.10.0
libtpu: 0.0.40
codegen_flags: <defaults>
</compile_context>

<pallas_src>
import functools

import jax
import jax.numpy as jnp
from jax import lax
from jax.experimental import pallas as pl
from jax.experimental.pallas import tpu as pltpu

LN_EPS = 1e-5  # torch.nn.LayerNorm default


def _round_up(x, m):
    return ((x + m - 1) // m) * m


def _cdiv(a, b):
    return (a + b - 1) // b


def _tpu_vmem_capacity_bytes():
    """Physical VMEM of the current generation (v7x 64 MiB, v5e/v6e 128 MiB)."""
    try:
        info = pltpu.get_tpu_info()
        cap = getattr(info, "vmem_capacity_bytes", None)
        if cap:
            return int(cap)
    except Exception:
        pass
    return 64 << 20  # conservative (v7x-sized) fallback


def _ffn_ln_kernel(x_ref, w1_ref, w2_ref, gamma_ref, beta_ref, o_ref,
                   acc_ref, xc_ref, *, compute_dtype):
    # x_ref    : (tm, D) input rows (resident across the F axis)
    # w1_ref   : (D, tf) W1 column chunk, already compute_dtype
    # w2_ref   : (tf, D) W2 row chunk,    already compute_dtype
    # acc_ref  : (tm, D) f32 accumulator scratch
    # xc_ref   : (tm, D) compute_dtype copy of x (cast once per row tile)
    f = pl.program_id(1)

    @pl.when(f == 0)
    def _init():
        acc_ref[...] = jnp.zeros_like(acc_ref)
        xc_ref[...] = x_ref[...].astype(compute_dtype)

    # fc1 chunk -> ReLU -> fc2 chunk; second matmul accumulated in f32.
    # First matmul produces compute_dtype directly (ReLU commutes with the
    # downcast), halving the live (tm, tf) intermediate in the bf16 path.
    h = jnp.dot(xc_ref[...], w1_ref[...], preferred_element_type=compute_dtype)
    h = jnp.maximum(h, 0)
    acc_ref[...] += jnp.dot(h, w2_ref[...], preferred_element_type=jnp.float32)

    @pl.when(f == pl.num_programs(1) - 1)
    def _epilogue():
        # residual + LayerNorm over d_model, all in f32 (VPU/EUP/XLU path).
        y = acc_ref[...] + x_ref[...].astype(jnp.float32)
        inv_d = jnp.float32(1.0 / y.shape[-1])
        mean = jnp.sum(y, axis=-1, keepdims=True) * inv_d
        meansq = jnp.sum(y * y, axis=-1, keepdims=True) * inv_d
        var = jnp.maximum(meansq - mean * mean, 0.0)
        norm = (y - mean) * lax.rsqrt(var + LN_EPS)
        out = norm * gamma_ref[...] + beta_ref[...]
        o_ref[...] = out.astype(o_ref.dtype)


def poswise_feedforward(hidden_state, w1, w2, gamma, beta, *,
                        tm=None, tf=None, compute_dtype=jnp.bfloat16):
    """hidden_state: [B, S, D]; w1: [D, F]; w2: [F, D]; gamma/beta: [D].

    tm: row tile (multiple of 8). Default: 512 on 128-MiB-VMEM chips, else 256.
    tf: d_ff tile (multiple of 128). Default: F if weights fit VMEM, else
        derived from the per-generation VMEM budget.
    compute_dtype: MXU operand dtype (bf16 fast path, f32 exact path).
    """
    B, S, D = hidden_state.shape
    F = w1.shape[1]
    M = B * S

    x_dtype = hidden_state.dtype
    x_isz = jnp.dtype(x_dtype).itemsize
    w_isz = jnp.dtype(compute_dtype).itemsize
    h_isz = w_isz            # dtype of the first-matmul output
    acc_isz = 4

    vmem_cap = _tpu_vmem_capacity_bytes()
    budget = int(vmem_cap * 0.7)          # sizing budget (compiler headroom)

    # ---- row tile: multiple of 8; >= 2 tiles so the parallel axis spans both
    # TensorCores on v7x (and megacore on v5e/v6e). -------------------------
    if tm is None:
        tm = 512 if vmem_cap >= (96 << 20) else 256
    tm_eff = max(8, (min(tm, _round_up(M, 8)) // 8) * 8)
    if M > 8 and _cdiv(M, tm_eff) < 2:
        tm_eff = max(8, _round_up(_cdiv(M, 2), 8))
    M_pad = _round_up(M, tm_eff)
    n_rows = M_pad // tm_eff

    # ---- d_ff tile: weights-resident fast path when W1+W2 fit VMEM --------
    per_row_tile_bytes = (2 * tm_eff * D * x_isz          # x tile (dbl buf)
                          + 2 * tm_eff * D * x_isz        # out tile (dbl buf)
                          + tm_eff * D * acc_isz          # acc scratch
                          + tm_eff * D * w_isz            # xc scratch
                          + 4 * D * 4)                    # gamma+beta (dbl buf)
    resident_w_bytes = 2 * 2 * D * F * w_isz              # W1+W2, dbl buffered
    hidden_full_bytes = tm_eff * F * h_isz

    if F < 128:
        tf_eff = F                                         # full-dim block
    elif tf is None and (resident_w_bytes + hidden_full_bytes
                         + per_row_tile_bytes <= budget):
        tf_eff = F                                         # weights DMA'd once
    else:
        avail = max(budget - per_row_tile_bytes, budget // 4)
        tf_cap_w = (avail * 6 // 10) // (4 * D * w_isz)    # 2 chunks x 2 bufs
        tf_cap_h = (avail * 3 // 10) // max(tm_eff * h_isz, 1)
        tf_cap = max(128, min(tf_cap_w, tf_cap_h))
        tf_req = tf if tf is not None else tf_cap
        tf_eff = max(128, min(tf_req, tf_cap, F))
        tf_eff = max(128, (tf_eff // 128) * 128)
        if F % 128 == 0:
            while F % tf_eff != 0:                         # divisor of F: no
                tf_eff -= 128                              # weight padding
            tf_eff = max(128, tf_eff)
    F_pad = _round_up(F, tf_eff)
    n_f = F_pad // tf_eff

    # ---- operand prep: flatten rows, pre-cast weights to compute_dtype ----
    x2d = hidden_state.reshape(M, D)
    if M_pad != M:
        x2d = jnp.pad(x2d, ((0, M_pad - M), (0, 0)))
    w1c = w1.astype(compute_dtype)
    w2c = w2.astype(compute_dtype)
    if F_pad != F:   # only when F is not a multiple of 128 and didn't fit VMEM
        w1c = jnp.pad(w1c, ((0, 0), (0, F_pad - F)))
        w2c = jnp.pad(w2c, ((0, F_pad - F), (0, 0)))
    gamma2d = gamma.reshape(1, D).astype(jnp.float32)
    beta2d = beta.reshape(1, D).astype(jnp.float32)

    # ---- scoped-VMEM limit from the actual tiles, capped per generation ---
    tile_bytes = (per_row_tile_bytes
                  + 2 * D * tf_eff * w_isz                 # W1 chunk (dbl buf)
                  + 2 * tf_eff * D * w_isz                 # W2 chunk (dbl buf)
                  + tm_eff * tf_eff * h_isz)               # hidden intermediate
    vmem_limit = int(min(max(int(tile_bytes * 1.4) + (4 << 20), 16 << 20),
                         int(vmem_cap * 0.85)))

    # ---- truthful cost estimate: weights are re-streamed n_rows times when
    # the F axis is tiled, once when resident. ------------------------------
    w_traffic = (1 if n_f == 1 else n_rows) * 2 * D * F_pad * w_isz
    cost = pl.CostEstimate(
        flops=4 * M * D * F,                   # two matmuls
        transcendentals=M,                     # rsqrt per row
        bytes_accessed=2 * M * D * x_isz + w_traffic + 2 * D * 4,
    )

    kernel = functools.partial(_ffn_ln_kernel, compute_dtype=compute_dtype)

    out2d = pl.pallas_call(
        kernel,
        out_shape=jax.ShapeDtypeStruct((M_pad, D), x_dtype),
        grid_spec=pltpu.PrefetchScalarGridSpec(
            num_scalar_prefetch=0,
            grid=(n_rows, n_f),                # rows parallel, d_ff reduction last
            in_specs=[
                pl.BlockSpec((tm_eff, D), lambda i, f: (i, 0)),   # x rows
                pl.BlockSpec((D, tf_eff), lambda i, f: (0, f)),   # W1 chunk
                pl.BlockSpec((tf_eff, D), lambda i, f: (f, 0)),   # W2 chunk
                pl.BlockSpec((1, D), lambda i, f: (0, 0)),        # gamma
                pl.BlockSpec((1, D), lambda i, f: (0, 0)),        # beta
            ],
            out_specs=pl.BlockSpec((tm_eff, D), lambda i, f: (i, 0)),
            scratch_shapes=[pltpu.VMEM((tm_eff, D), jnp.float32),   # accumulator
                            pltpu.VMEM((tm_eff, D), compute_dtype)],  # cast x
        ),
        compiler_params=pltpu.CompilerParams(
            dimension_semantics=("parallel", "arbitrary"),
            vmem_limit_bytes=vmem_limit,
        ),
        cost_estimate=cost,
    )(x2d, w1c, w2c, gamma2d, beta2d)

    return out2d[:M].reshape(B, S, D)


def reference(hidden_state, w1, w2, gamma, beta):
    h = jnp.maximum(hidden_state @ w1, 0.0)
    y = h @ w2 + hidden_state
    mean = jnp.mean(y, axis=-1, keepdims=True)
    var = jnp.mean((y - mean) ** 2, axis=-1, keepdims=True)
    return (y - mean) / jnp.sqrt(var + LN_EPS) * gamma + beta


if __name__ == "__main__":
    # Hyperparameters implied by the module (args.d_model, args.d_feedforward, args.std_rate)
    B, S = 2, 8
    d_model, d_ff = 32, 64
    std_rate = 0.5

    key = jax.random.PRNGKey(0)
    kx, kw1, kw2 = jax.random.split(key, 3)

    hidden_state = jax.random.normal(kx, (B, S, d_model), dtype=jnp.float32)
    # nn.Linear weights: init.normal_(std = input_size ** (-std_rate)), no bias.
    # Stored already transposed to math orientation (x @ W).
    w1 = jax.random.normal(kw1, (d_model, d_ff), jnp.float32) * (d_model ** (-std_rate))
    w2 = jax.random.normal(kw2, (d_ff, d_model), jnp.float32) * (d_ff ** (-std_rate))
    gamma = jnp.ones((d_model,), jnp.float32)
    beta = jnp.zeros((d_model,), jnp.float32)

    ref = reference(hidden_state, w1, w2, gamma, beta)

    # Exact path (f32 MXU operands) — matches the PyTorch module tightly.
    out_f32 = jax.block_until_ready(
        poswise_feedforward(hidden_state, w1, w2, gamma, beta,
                            compute_dtype=jnp.float32))
    assert out_f32.shape == (B, S, d_model)
    assert jnp.allclose(out_f32, ref, atol=3e-5, rtol=3e-5)

    # Recommended fast path: bf16 pre-cast weights, bf16 MXU operands,
    # f32 accumulation + f32 LayerNorm.
    out_bf16 = jax.block_until_ready(
        poswise_feedforward(hidden_state, w1, w2, gamma, beta,
                            compute_dtype=jnp.bfloat16))
    assert jnp.allclose(out_bf16, ref, atol=3e-2, rtol=3e-2)

    # Larger check exercising explicit d_ff tiling (3 F-steps), multiple row
    # tiles and tail padding of M (192 rows -> 2 tiles of 128).
    B2, S2, D2, F2 = 2, 96, 128, 384
    k2 = jax.random.PRNGKey(1)
    kx2, kw12, kw22 = jax.random.split(k2, 3)
    x2 = jax.random.normal(kx2, (B2, S2, D2), dtype=jnp.float32)
    w1b = jax.random.normal(kw12, (D2, F2), jnp.float32) * (D2 ** (-std_rate))
    w2b = jax.random.normal(kw22, (F2, D2), jnp.float32) * (F2 ** (-std_rate))
    g2 = jnp.ones((D2,), jnp.float32)
    b2 = jnp.zeros((D2,), jnp.float32)
    ref2 = reference(x2, w1b, w2b, g2, b2)
    out2 = jax.block_until_ready(
        poswise_feedforward(x2, w1b, w2b, g2, b2,
                            tm=128, tf=128, compute_dtype=jnp.float32))
    assert out2.shape == (B2, S2, D2)
    assert jnp.allclose(out2, ref2, atol=1e-3, rtol=1e-3)

    # Same shapes on the default (weights-resident, bf16) fast path.
    out3 = jax.block_until_ready(poswise_feedforward(x2, w1b, w2b, g2, b2))
    assert jnp.allclose(out3, ref2, atol=3e-2, rtol=3e-2)

    print("KERNEL_OK")
</pallas_src>

<mosaic_0001>
module attributes {stable_mosaic.version = 11 : i64} {
  func.func @_ffn_ln_kernel(%arg0: i32, %arg1: i32, %arg2: memref<8x32xf32, #tpu.memory_space<vmem>>, %arg3: memref<32x64xf32, #tpu.memory_space<vmem>>, %arg4: memref<64x32xf32, #tpu.memory_space<vmem>>, %arg5: memref<1x32xf32, #tpu.memory_space<vmem>>, %arg6: memref<1x32xf32, #tpu.memory_space<vmem>>, %arg7: memref<8x32xf32, #tpu.memory_space<vmem>>, %arg8: memref<8x32xf32, #tpu.memory_space<vmem>>, %arg9: memref<8x32xf32, #tpu.memory_space<vmem>>) attributes {dimension_semantics = [#tpu.dimension_semantics<parallel>, #tpu.dimension_semantics<arbitrary>], iteration_bounds = array<i64: 2, 1>, scalar_prefetch = 0 : i64, scratch_operands = 2 : i64, tpu.core_type = #tpu.core_type<tc>, window_params = [{transform_indices = @transform_0, window_bounds = array<i64: 8, 32>}, {transform_indices = @transform_1, window_bounds = array<i64: 32, 64>}, {transform_indices = @transform_2, window_bounds = array<i64: 64, 32>}, {pipeline_mode = #tpu.pipeline_mode<synchronous>, transform_indices = @transform_3, window_bounds = array<i64: 1, 32>}, {pipeline_mode = #tpu.pipeline_mode<synchronous>, transform_indices = @transform_4, window_bounds = array<i64: 1, 32>}, {transform_indices = @transform_5, window_bounds = array<i64: 8, 32>}]} {
    %c0_i32 = arith.constant 0 : i32
    %0 = arith.cmpi eq, %arg1, %c0_i32 : i32
    %1 = arith.extui %0 : i1 to i32
    %c0_i32_0 = arith.constant 0 : i32
    %2 = arith.cmpi ne, %1, %c0_i32_0 : i32
    scf.if %2 {
      %cst_14 = arith.constant 0.000000e+00 : f32
      %16 = vector.broadcast %cst_14 : f32 to vector<8x32xf32>
      %c0_15 = arith.constant 0 : index
      %c0_16 = arith.constant 0 : index
      %17 = vector.load %arg8[%c0_15, %c0_16] : memref<8x32xf32, #tpu.memory_space<vmem>>, vector<8x32xf32>
      tpu.vector_store %arg8[%c0_15, %c0_16], %16 {strides = array<i32>} : memref<8x32xf32, #tpu.memory_space<vmem>>, vector<8x32xf32>,
      %c0_17 = arith.constant 0 : index
      %c0_18 = arith.constant 0 : index
      %18 = vector.load %arg2[%c0_17, %c0_18] : memref<8x32xf32, #tpu.memory_space<vmem>>, vector<8x32xf32>
      %c0_19 = arith.constant 0 : index
      %c0_20 = arith.constant 0 : index
      %19 = vector.load %arg9[%c0_19, %c0_20] : memref<8x32xf32, #tpu.memory_space<vmem>>, vector<8x32xf32>
      tpu.vector_store %arg9[%c0_19, %c0_20], %18 {strides = array<i32>} : memref<8x32xf32, #tpu.memory_space<vmem>>, vector<8x32xf32>,
    } else {
    }
    %c0 = arith.constant 0 : index
    %c0_1 = arith.constant 0 : index
    %3 = vector.load %arg9[%c0, %c0_1] : memref<8x32xf32, #tpu.memory_space<vmem>>, vector<8x32xf32>
    %c0_2 = arith.constant 0 : index
    %c0_3 = arith.constant 0 : index
    %4 = vector.load %arg3[%c0_2, %c0_3] : memref<32x64xf32, #tpu.memory_space<vmem>>, vector<32x64xf32>
    %cst = arith.constant dense<0.000000e+00> : vector<8x64xf32>
    %5 = tpu.matmul %3, %4, %cst {dimension_numbers = #tpu.dot_dimension_numbers<[1], [0], [0], [1], [0, 0, 1, 1], [], []>} : vector<8x32xf32>, vector<32x64xf32>, vector<8x64xf32> -> vector<8x64xf32>
    %cst_4 = arith.constant 0.000000e+00 : f32
    %6 = vector.broadcast %cst_4 : f32 to vector<8x64xf32>
    %7 = arith.maximumf %5, %6 : vector<8x64xf32>
    %c0_5 = arith.constant 0 : index
    %c0_6 = arith.constant 0 : index
    %8 = vector.load %arg8[%c0_5, %c0_6] : memref<8x32xf32, #tpu.memory_space<vmem>>, vector<8x32xf32>
    %c0_7 = arith.constant 0 : index
    %c0_8 = arith.constant 0 : index
    %9 = vector.load %arg4[%c0_7, %c0_8] : memref<64x32xf32, #tpu.memory_space<vmem>>, vector<64x32xf32>
    %cst_9 = arith.constant dense<0.000000e+00> : vector<8x32xf32>
    %10 = tpu.matmul %7, %9, %cst_9 {dimension_numbers = #tpu.dot_dimension_numbers<[1], [0], [0], [1], [0, 0, 1, 1], [], []>} : vector<8x64xf32>, vector<64x32xf32>, vector<8x32xf32> -> vector<8x32xf32>
    %11 = arith.addf %8, %10 : vector<8x32xf32>
    %c0_10 = arith.constant 0 : index
    %c0_11 = arith.constant 0 : index
    %12 = vector.load %arg8[%c0_10, %c0_11] : memref<8x32xf32, #tpu.memory_space<vmem>>, vector<8x32xf32>
    tpu.vector_store %arg8[%c0_10, %c0_11], %11 {strides = array<i32>} : memref<8x32xf32, #tpu.memory_space<vmem>>, vector<8x32xf32>,
    %c0_i32_12 = arith.constant 0 : i32
    %13 = arith.cmpi eq, %arg1, %c0_i32_12 : i32
    %14 = arith.extui %13 : i1 to i32
    %c0_i32_13 = arith.constant 0 : i32
    %15 = arith.cmpi ne, %14, %c0_i32_13 : i32
    scf.if %15 {
      %c0_14 = arith.constant 0 : index
      %c0_15 = arith.constant 0 : index
      %16 = vector.load %arg8[%c0_14, %c0_15] : memref<8x32xf32, #tpu.memory_space<vmem>>, vector<8x32xf32>
      %c0_16 = arith.constant 0 : index
      %c0_17 = arith.constant 0 : index
      %17 = vector.load %arg2[%c0_16, %c0_17] : memref<8x32xf32, #tpu.memory_space<vmem>>, vector<8x32xf32>
      %18 = arith.addf %16, %17 : vector<8x32xf32>
      %cst_18 = arith.constant dense<0.000000e+00> : vector<8xf32>
      %19 = vector.multi_reduction <add>, %18, %cst_18 [1] : vector<8x32xf32> to vector<8xf32>
      %20 = vector.shape_cast %19 : vector<8xf32> to vector<8x1xf32>
      %cst_19 = arith.constant 3.125000e-02 : f32
      %21 = vector.broadcast %cst_19 : f32 to vector<8x1xf32>
      %22 = arith.mulf %20, %21 : vector<8x1xf32>
      %23 = arith.mulf %18, %18 : vector<8x32xf32>
      %cst_20 = arith.constant dense<0.000000e+00> : vector<8xf32>
      %24 = vector.multi_reduction <add>, %23, %cst_20 [1] : vector<8x32xf32> to vector<8xf32>
      %25 = vector.shape_cast %24 : vector<8xf32> to vector<8x1xf32>
      %cst_21 = arith.constant 3.125000e-02 : f32
      %26 = vector.broadcast %cst_21 : f32 to vector<8x1xf32>
      %27 = arith.mulf %25, %26 : vector<8x1xf32>
      %28 = arith.mulf %22, %22 : vector<8x1xf32>
      %29 = arith.subf %27, %28 : vector<8x1xf32>
      %cst_22 = arith.constant 0.000000e+00 : f32
      %30 = vector.broadcast %cst_22 : f32 to vector<8x1xf32>
      %31 = arith.maximumf %29, %30 : vector<8x1xf32>
      %32 = vector.broadcast %22 : vector<8x1xf32> to vector<8x32xf32>
      %33 = arith.subf %18, %32 : vector<8x32xf32>
      %cst_23 = arith.constant 9.99999974E-6 : f32
      %34 = vector.broadcast %cst_23 : f32 to vector<8x1xf32>
      %35 = arith.addf %31, %34 : vector<8x1xf32>
      %36 = math.rsqrt %35 : vector<8x1xf32>
      %37 = vector.broadcast %36 : vector<8x1xf32> to vector<8x32xf32>
      %38 = arith.mulf %33, %37 : vector<8x32xf32>
      %c0_24 = arith.constant 0 : index
      %c0_25 = arith.constant 0 : index
      %39 = vector.load %arg5[%c0_24, %c0_25] : memref<1x32xf32, #tpu.memory_space<vmem>>, vector<1x32xf32>
      %40 = vector.broadcast %39 : vector<1x32xf32> to vector<8x32xf32>
      %41 = arith.mulf %38, %40 : vector<8x32xf32>
      %c0_26 = arith.constant 0 : index
      %c0_27 = arith.constant 0 : index
      %42 = vector.load %arg6[%c0_26, %c0_27] : memref<1x32xf32, #tpu.memory_space<vmem>>, vector<1x32xf32>
      %43 = vector.broadcast %42 : vector<1x32xf32> to vector<8x32xf32>
      %44 = arith.addf %41, %43 : vector<8x32xf32>
      %c0_28 = arith.constant 0 : index
      %c0_29 = arith.constant 0 : index
      %45 = vector.load %arg7[%c0_28, %c0_29] : memref<8x32xf32, #tpu.memory_space<vmem>>, vector<8x32xf32>
      tpu.vector_store %arg7[%c0_28, %c0_29], %44 {strides = array<i32>} : memref<8x32xf32, #tpu.memory_space<vmem>>, vector<8x32xf32>,
    } else {
    }
    return
  }
  func.func @transform_0(%arg0: i32, %arg1: i32) -> (i32, i32) {
    %c0_i32 = arith.constant 0 : i32
    %c0_i32_0 = arith.constant 0 : i32
    return %arg0, %c0_i32 : i32, i32
  }
  func.func @transform_1(%arg0: i32, %arg1: i32) -> (i32, i32) {
    %c0_i32 = arith.constant 0 : i32
    %c0_i32_0 = arith.constant 0 : i32
    return %c0_i32, %arg1 : i32, i32
  }
  func.func @transform_2(%arg0: i32, %arg1: i32) -> (i32, i32) {
    %c0_i32 = arith.constant 0 : i32
    %c0_i32_0 = arith.constant 0 : i32
    return %arg1, %c0_i32 : i32, i32
  }
  func.func @transform_3(%arg0: i32, %arg1: i32) -> (i32, i32) {
    %c0_i32 = arith.constant 0 : i32
    %c0_i32_0 = arith.constant 0 : i32
    %c0_i32_1 = arith.constant 0 : i32
    return %c0_i32, %c0_i32_0 : i32, i32
  }
  func.func @transform_4(%arg0: i32, %arg1: i32) -> (i32, i32) {
    %c0_i32 = arith.constant 0 : i32
    %c0_i32_0 = arith.constant 0 : i32
    %c0_i32_1 = arith.constant 0 : i32
    return %c0_i32, %c0_i32_0 : i32, i32
  }
  func.func @transform_5(%arg0: i32, %arg1: i32) -> (i32, i32) {
    %c0_i32 = arith.constant 0 : i32
    %c0_i32_0 = arith.constant 0 : i32
    return %arg0, %c0_i32 : i32, i32
  }
}

</mosaic_0001>

<bundles_post_ra>
// kernel: tpu_custom_call.1
= control target key start
LH: loop header
LB: loop body
LE: loop exit
PB: predicated region body
PF: predicated region fallthrough
CT: control target
= control target key end

     0   :  { %10 = vsyncpa [#allocation5], 0  ;;  %s1008_s0 = inlined_call_operand.vmem [shape: f32[16,32], index: 0, kind: input, shape index: {}]   ;;  %s1009_s1 = inlined_call_operand.vmem [shape: f32[32,64], index: 1, kind: input, shape index: {}]   ;;  %s1010_s2 = inlined_call_operand.vmem [shape: f32[64,32], index: 2, kind: input, shape index: {}]   ;;  %s1011_s3 = inlined_call_operand.vmem [shape: f32[1,32], index: 3, kind: input, shape index: {}]   ;;  %s1012_s4 = inlined_call_operand.vmem [shape: f32[1,32], index: 4, kind: input, shape index: {}]   ;;  %s1013_s5 = inlined_call_operand.hbm [shape: f32[16,32], index: 5, kind: output, shape index: {}]  }
   0x1   :  { %12 = vsyncpa [#allocation5 + $0x1], 0  ;;  %s847_s18 = smov 0   ;;  %s849_s19 = smov 0  }
   0x2   :  { %s851_s20 = smov 0   ;;  %s853_s21 = smov 0  }
   0x3   :  { %s855_s22 = smov 0   ;;  %s857_s23 = smov 0  }
   0x4 LB: > { %s594_s24 = sadd.s32 4294967295, %s811_s23   ;;  %s595_s25 = sadd.s32 4294967294, %s811_s23   ;;  %s811_s23 = sphi %s857_s23, %s18_s23   ;;  %s807_s22 = sphi %s855_s22, %s1020_s22   ;;  %s803_s21 = sphi %s853_s21, %s1019_s21   ;;  %s799_s20 = sphi %s851_s20, %s1018_s20   ;;  %s795_s19 = sphi %s849_s19, %s1017_s19   ;;  %s791_s18 = sphi %s847_s18, %s1016_s18  }
   0x5   : > { %s30_s26 = sadd.s32 1, %s807_s22  ;;  %s157_s27 = sadd.s32 1, %s799_s20 }
   0x6   : > { %p32_p0 = scmp.ge.s32.totalorder %s30_s26, 2  ;;  %p167_p1 = scmp.ne.s32.totalorder %s799_s20, %s795_s19 }
   0x7   : > { %p168_p2 = scmp.eq.s32.totalorder %s594_s24, 1  ;;  %p173_p3 = scmp.ne.s32.totalorder %s795_s19, %s791_s18 }
   0x8   : > { %s1022_s26 = smov (%p32_p0, %s30_s26), 0  ;;  %p174_p5 = scmp.eq.s32.totalorder %s595_s25, 1 }
   0x9   : > { %p887_p4 = por %p168_p2, %p167_p1  ;;  %s154_s29 = ssub.s32 %s807_s22, %s1022_s26 }
   0xa   : > { %p600_p6 = scmp.ge.s32.totalorder %s811_s23, 1  ;;  %p155_p7 = scmp.eq.s32.totalorder %s154_s29, 0 }
   0xb   : > { %p894_p8 = por %p174_p5, %p173_p3  ;;  %p221_p9 = scmp.lt.s32.totalorder %s811_s23, 3 }
   0xc   : > { %s900_s6 = scalar_select %p155_p7, %s799_s20, %s157_s27  }
   0xd   : > { %p222_p10 = pnand %p600_p6, %p221_p9 }
   0xe   : > { %v280_v0 = vld [vmem:[%s1009_s1] sm:$0xff] (!%p222_p10)  ;;  %v281_v1 = vld [vmem:[%s1009_s1 + $0x8] sm:$0xff] (!%p222_p10)  ;;  %v282_v2 = vld [vmem:[%s1009_s1 + $0x10] sm:$0xff] (!%p222_p10)  ;;  %p257_p11 = scmp.lt.s32.totalorder (!%p222_p10), %s803_s21, 1  ;;  %v813_v3 = vmov (!%p222_p10), 0.0|0.0   ;;  %vm275_vm0 = vcmask (!%p222_p10), 261120  }
   0xf   : > { %225 = sbr.rel (%p222_p10) target bundleno = 659 (0x293), region = 40  ;;  %655 = vmatprep.subr.bf16.mxu0 (!%p222_p10), %v813_v3  ;;  %v656_v4 = vpack.c.bf16 (!%p222_p10), %v281_v1, %v280_v0  ;;  %v283_v5 = vld [vmem:[%s1009_s1 + $0x18] sm:$0xff] (!%p222_p10)  ;;  %661 = vmatprep.subr.bf16.mxu1 (!%p222_p10), %v813_v3  ;;  %v360_v6 = vld [vmem:[%s1010_s2] sm:$0xff] (!%p222_p10)  ;;  %v361_v7 = vld [vmem:[%s1010_s2 + $0x8] sm:$0xff] (!%p222_p10)  ;;  %v814_v8 = vmov (!%p222_p10), 0.0   ;;  %vm815_vm1 = vmmov (!%p222_p10), 0  }
  0x10   : > { %276 = vst.msk [vmem:[#allocation2] sm:$0xff] (!%p222_p10), %vm275_vm0, %v814_v8  ;;  %633 = vmatprep.mubr.msk.f32.mxu0 (!%p222_p10), %vm815_vm1, %v814_v8  ;;  %v662_v9 = vpack.c.bf16 (!%p222_p10), %v361_v7, %v360_v6  ;;  %v362_v10 = vld [vmem:[%s1010_s2 + $0x10] sm:$0xff] (!%p222_p10)  ;;  %v363_v11 = vld [vmem:[%s1010_s2 + $0x18] sm:$0xff] (!%p222_p10)  ;;  %652 = vmatprep.mubr.msk.f32.mxu1 (!%p222_p10), %vm815_vm1, %v814_v8  ;;  %v659_v12 = vpack.c.bf16 (!%p222_p10), %v283_v5, %v282_v2  ;;  %v364_v14 = vld [vmem:[%s1010_s2 + $0x20] sm:$0xff] (!%p222_p10)  ;;  %vm368_vm2 = vcmask (!%p222_p10), 523264   ;;  %s254_s29 = sand.u32 (!%p222_p10), 1, %s795_s19  }
  0x11   : > { %657 = vmatpush3.bf16.msra.mxu0 (!%p222_p10), %v656_v4  ;;  %v665_v13 = vpack.c.bf16 (!%p222_p10), %v363_v11, %v362_v10  ;;  %v365_v15 = vld [vmem:[%s1010_s2 + $0x28] sm:$0xff] (!%p222_p10)  ;;  %v366_v19 = vld [vmem:[%s1010_s2 + $0x30] sm:$0xff] (!%p222_p10)  ;;  %v367_v20 = vld [vmem:[%s1010_s2 + $0x38] sm:$0xff] (!%p222_p10)  ;;  %s601_s7 = sshll.u32 (!%p222_p10), %s254_s29, 3  ;;  %s484_s24 = scalar_lea.sflag (!%p222_p10), [#allocation5], %s254_s29 }
  0x12   : > { %658 = vmatprep.subr.bf16.mxu0 (!%p222_p10), %v813_v3  ;;  %663 = vmatpush3.bf16.msra.mxu1 (!%p222_p10), %v662_v9  ;;  %v668_v17 = vpack.c.bf16 (!%p222_p10), %v365_v15, %v364_v14  ;;  %v671_v21 = vpack.c.bf16 (!%p222_p10), %v367_v20, %v366_v19  ;;  %v605_v44 = vld [vmem:[%s1011_s3] ss:$0 sm:$0xff] (!%p222_p10)  ;;  %s256_s13 = scalar_lea.vmem (!%p222_p10), [#allocation4], %s601_s7 }
  0x13   : > { %664 = vmatprep.subr.bf16.mxu1 (!%p222_p10), %v813_v3  ;;  %v606_v46 = vld [vmem:[%s1012_s4] ss:$0 sm:$0xff] (!%p222_p10)  ;;  %s497_s14 = sshll.u32 (!%p222_p10), %s256_s13, 4  ;;  %s962_s14 = int_to_ptr.vmem [resolvable:$true] %s497_s14 }
  0x15   : > { %660 = vmatpush3.bf16.msra.mxu0 (!%p222_p10), %v659_v12 }
  0x16   : > { %s258_s25 = scalar_select %p257_p11, %s803_s21, 1  ;;  %666 = vmatpush3.bf16.msra.mxu1 %v665_v13 }
  0x17   : > { %667 = vmatprep.subr.bf16.mxu1 %v813_v3  ;;  %v359_v25 = vld [vmem:[#allocation2] sm:$0xff] }
  0x18   : > { %s602_s9 = sshll.u32 %s258_s25, 3  ;;  %s733_s25 = scalar_lea.vmem %s962_s14, 128 }
  0x19   : > { %s260_s12 = scalar_lea.vmem %s1008_s0, %s602_s9  ;;  %p734_p12 = scmp.ne.s32.totalorder %s962_s14, %s733_s25 }
  0x1a   : > { %v277_v16 = vld [vmem:[%s260_s12] sm:$0xff]  ;;  %669 = vmatpush3.bf16.msra.mxu1 %v668_v17  ;;  %s608_s12 = sshll.u32 %s803_s21, 7  ;;  %s816_s21 = smov [#allocation4]  }
  0x1b   : > { %278 = vst.msk [vmem:[#allocation3] sm:$0xff] %vm275_vm0, %v277_v16  ;;  %670 = vmatprep.subr.bf16.mxu1 %v813_v3  ;;  %s960_s17 = scalar_lea.hbm %s1013_s5, %s608_s12  ;;  %p735_p13 = pnand %p734_p12, %p887_p4 }
  0x1c   : > { %s737_s27 = sshll.u32 %s816_s21, 4  ;;  %s738_s27 = int_to_ptr.vmem [resolvable:$false] %s737_s27 }
  0x1d   : > { %p736_p0 = pneg %p735_p13  ;;  %s739_s7 = scalar_lea.vmem %s738_s27, 256 }
  0x1e   : > { %672 = vmatpush3.bf16.msra.mxu1 %v671_v21  ;;  %p740_p1 = scmp.lt.s32.totalorder %s962_s14, %s738_s27  ;;  %p741_p2 = scmp.lt.s32.totalorder %s739_s7, %s733_s25 }
  0x20   : > { %p742_p3 = por %p741_p2, %p740_p1 }
  0x22   : > { %v279_v18 = vld [vmem:[#allocation3] sm:$0xff]  ;;  %p743_p5 = pnand %p742_p3, %p736_p0 }
  0x23   : > { %634 = vmatmul.mubr.msk.f32.vlgmr.msra.gmra.mrb[0].mxu0 %vm275_vm0, %v279_v18 }
  0xf6   : > { %v354_v22 = vpop.f32.mrb[0].mxu0 }
  0xf7   : > { %v358_v23 = vmax.f32 %v354_v22, 0.0  ;;  %v635_v24 = vpop.f32.mrb[1].mxu0 }
  0xf9   : > { %653 = vmatmul.mubr.msk.f32.vlgmr.msra.gmra.mrb[0].mxu1 %vm368_vm2, %v358_v23 }
 0x1cc   : > { %v438_v26 = vpop.f32.mrb[0].mxu1 }
 0x1cd   : > { %v442_v27 = vadd.f32 %v438_v26, %v359_v25  ;;  %v654_v28 = vpop.f32.mrb[1].mxu1 }
 0x1cf   : > { %443 = vst.msk [vmem:[#allocation2] sm:$0xff] %vm275_vm0, %v442_v27 }
 0x1d6   : > { %v447_v29 = vld [vmem:[#allocation2] sm:$0xff] }
 0x1d7   : > { %v449_v30 = vadd.f32 %v447_v29, %v277_v16 }
 0x1d9   : > { %v450_v31 = vsel %vm275_vm0, %v449_v30, 0.0  ;;  %v454_v32 = vmul.f32 %v449_v30, %v449_v30 }
 0x1da   : > { %451 = vadd.xlane.f32.xlu0 %v450_v31 }
 0x1db   : > { %v455_v33 = vsel %vm275_vm0, %v454_v32, 0.0 }
 0x1de   : > { %456 = vadd.xlane.f32.xlu0 %v455_v33 }
 0x267   : > { %v452_v34 = vpop.xlane.xlu0 %451 }
 0x268   : > { %v453_v35 = vmul.f32 0.03125, %v452_v34 }
 0x26a   : > { %v459_v37 = vmul.f32 %v453_v35, %v453_v35  ;;  %v462_v42 = vsub.f32 %v449_v30, %v453_v35 }
 0x26b   : > { %v457_v36 = vpop.xlane.xlu0 %456 }
 0x26c   : > { %v458_v38 = vmul.f32 0.03125, %v457_v36 }
 0x26e   : > { %v460_v39 = vsub.f32 %v458_v38, %v459_v37 }
 0x270   : > { %v461_v40 = vmax.f32 %v460_v39, 0.0 }
 0x272   : > { %v463_v41 = vadd.f32 1e-05, %v461_v40 }
 0x274   : > { %731 = vrsqrt.f32 %v463_v41 }
 0x27e   : > { %v732_v43 = vpop.eup %731 }
 0x27f   : > { %v465_v45 = vmul.f32 %v732_v43, %v462_v42 }
 0x281   : > { %v473_v47 = vmul.f32 %v605_v44, %v465_v45 }
 0x283   : > { %v481_v48 = vadd.f32 %v606_v46, %v473_v47 }
 0x285   : > { %482 = vst.msk [vmem:[%s256_s13] sm:$0xff] %vm275_vm0, %v481_v48 }
 0x286   : > { %746 = shalt.err (!%p743_p5)
}
 0x287   : > { %s747_s29 = scalar_lea.hbm %s960_s17, 128  ;;  %s751_s10 = scalar_lea.hbm %s1013_s5, 256 }
 0x288   : > { %p748_p6 = scmp.ne.s32.totalorder %s960_s17, %s747_s29  ;;  %p752_p10 = scmp.lt.u32.totalorder %s960_s17, %s1013_s5 }
 0x289   : > { %p753_p11 = scmp.lt.u32.totalorder %s751_s10, %s747_s29  ;;  %p755_p13 = scmp.lt.u32.totalorder %s747_s29, %s960_s17 }
 0x28a   : > { %p749_p7 = pnand %p748_p6, %p887_p4 }
 0x28b   : > { %p754_p12 = por %p753_p11, %p752_p10 }
 0x28c   : > { %p750_p9 = pneg %p749_p7 }
 0x28d   : > { %p756_p0 = por %p755_p13, %p754_p12 }
 0x28f   : > { %p757_p1 = pnand %p756_p0, %p750_p9 }
 0x291   : > { %760 = shalt.err (!%p757_p1)
}
 0x292   : > { %673 = dma.vmem_to_hbm [thread:$0]  (%p887_p4), %s962_s14, 128, %s960_s17, %s484_s24  }
 0x293 PF: > { %p679_p2 = scmp.ge.s32.totalorder %s811_s23, 2  ;;  %s509_s13 = sand.u32 1, %s791_s18  }
 0x294   : > { %s510_s15 = scalar_lea.sflag [#allocation5], %s509_s13 }
 0x295   : > { %p676_p3 = pnand %p679_p2, %p894_p8 }
 0x297   : > { %786 = dma.done.wait (!%p676_p3), %s510_s15, 128  }
 0x298   : > { %788 = vsyncadd (!%p676_p3), %s510_s15, 4294967168  ;;  %s18_s23 = sadd.s32 1, %s811_s23   ;;  %s1016_s18 = smov %s795_s19 }
 0x299   : > { %p15_p5 = scmp.ge.s32.totalorder %s18_s23, 4   ;;  %s1017_s19 = smov %s799_s20 }
 0x29a   : > { %s1018_s20 = smov %s900_s6  ;;  %s1019_s21 = smov %s807_s22 }
 0x29b   : > { %s1020_s22 = smov %s1022_s26  ;;  %17 = sbr.rel (!%p15_p5) target bundleno = 4 (0x4), region = 89 }
 0x2a2   :  { %515 = vsyncpa [#allocation5], 1 }
 0x2a3   :  { %517 = vsyncpa [#allocation5 + $0x1], 1 }

</bundles_post_ra>
